<compile_context>
chip_gen: v7x
topology: tpu7x:2x2x1
jax: 0.10.0
libtpu: 0.0.40
codegen_flags: <defaults>
</compile_context>

<pallas_src>
import functools

import jax
import jax.numpy as jnp
from jax.experimental import pallas as pl
from jax.experimental.pallas import tpu as pltpu

N_BINS = 32
OUT_LANES = 32           # packed output width: [sigmoid head | attn | zero pad]


def _frame_stack_kernel(x_ref, enc_ref,
                        xw_ref, xb_ref, awe_ref, v_ref, l2w_ref, l2b_ref,
                        slab_ref, epad_ref, *, w_size):
    """One batch-tile per grid step.

    x_ref:    (TB, S, N)        hidden features
    enc_ref:  (TB, S, N)        encoder outputs (UNpadded; halo built in VMEM)
    xw_ref:   (N, Ma+Ml)        fused [attn_hidden_half | linear1] weight
    xb_ref:   (1, Ma+Ml)        fused [attn_b | l1_b]
    slab_ref: (TB, S, 32)       packed output: [:, :, :O]=sigmoid, [:, :, O:O+W]=attn
    epad_ref: (TB, Sp_pad, N)   VMEM scratch for the zero-halo padded encoder
    """
    TB, S, N = enc_ref.shape
    R = TB * S
    W = 2 * w_size + 1
    Ma = awe_ref.shape[1]                       # attention model_size
    O = l2b_ref.shape[1]
    Sp = epad_ref.shape[1]

    x = x_ref[...].reshape(R, N)

    # Zero-halo padded encoder built in VMEM (replaces the wrapper-side HBM pad).
    epad_ref[...] = jnp.zeros_like(epad_ref)
    epad_ref[:, w_size:w_size + S, :] = enc_ref[...]
    enc_pad = epad_ref[...]                                            # (TB, Sp, N)

    # Fused x-side projection: one (R, N) @ (N, Ma+Ml) dot; split lanes after.
    xp = jnp.dot(x, xw_ref[...], preferred_element_type=jnp.float32) + xb_ref[...]
    hpart = xp[:, :Ma]                          # attn hidden half (+ attn bias)
    h1 = jnp.maximum(xp[:, Ma:], 0.0)           # relu(linear1(x))

    # Encoder half of the attention projection, ONCE over the padded block.
    # Zero-padded rows project to exactly zero -> as_strided zero-halo semantics.
    eproj = jnp.dot(enc_pad.reshape(TB * Sp, N), awe_ref[...],
                    preferred_element_type=jnp.float32).reshape(TB, Sp, Ma)

    v = v_ref[...]                              # (Ma, 1)
    logit_cols = []
    for w in range(W):                          # W small & static -> unrolled
        ew = eproj[:, w:w + S, :].reshape(R, Ma)
        energy = jnp.tanh(hpart + ew)
        logit_cols.append(
            jnp.dot(energy, v, preferred_element_type=jnp.float32))    # (R, 1)
    logits = jnp.concatenate(logit_cols, axis=-1)                      # (R, W)

    # Softmax over the window axis.
    m = jnp.max(logits, axis=-1, keepdims=True)
    e = jnp.exp(logits - m)
    attn = e * pl.reciprocal(jnp.sum(e, axis=-1, keepdims=True), approx=False)

    # weighted = a @ windowed_encoder from shifted views of the padded block.
    weighted = jnp.zeros((R, N), dtype=jnp.float32)
    for w in range(W):
        weighted = weighted + attn[:, w:w + 1] * enc_pad[:, w:w + S, :].reshape(R, N)

    # Fused head: sigmoid(cat(relu(l1(x)), weighted) @ l2 + b) as one K=Ml+N dot.
    z = (jnp.dot(jnp.concatenate([h1, weighted], axis=-1), l2w_ref[...],
                 preferred_element_type=jnp.float32) + l2b_ref[...])
    out = 0.5 * (jnp.tanh(0.5 * z) + 1.0)       # sigmoid via tanh (EUP)

    # Single dense store of the packed (sigmoid | attn | zero-pad) slab.
    pieces = [out, attn]
    pad_cols = slab_ref.shape[-1] - O - W
    if pad_cols > 0:
        pieces.append(jnp.zeros((R, pad_cols), dtype=jnp.float32))
    slab_ref[...] = jnp.concatenate(pieces, axis=-1).reshape(TB, S, slab_ref.shape[-1])


def frame_stack_with_attn(x, encoder_outputs, params, w_size, *, rows_per_tile=4096):
    attn_w, attn_b, v_w, l1_w, l1_b, l2_w, l2_b = params
    B, S, N = encoder_outputs.shape
    W = 2 * w_size + 1
    Ma = attn_w.shape[1]
    Ml = l1_w.shape[1]
    O = l2_w.shape[1]
    assert O + W <= OUT_LANES, "packed output slab too narrow"

    # --- batch tiling -------------------------------------------------------
    # As many batch elements per grid step as fit the row budget, but keep at
    # least 2 tiles when B >= 2 so the "parallel" grid axis can shard across
    # v7x's two TensorCores (free on v5e / v6e).
    TB = max(1, min(B, rows_per_tile // max(S, 1)))
    if B >= 2:
        TB = min(TB, (B + 1) // 2)
    Bp = pl.cdiv(B, TB) * TB

    xf = x.astype(jnp.float32)
    ef = encoder_outputs.astype(jnp.float32)
    if Bp != B:                                  # batch-tail pad only when needed
        xf = jnp.pad(xf, ((0, Bp - B), (0, 0), (0, 0)))
        ef = jnp.pad(ef, ((0, Bp - B), (0, 0), (0, 0)))

    # Fused x-side weights: attention hidden half + linear1 in one (N, Ma+Ml) dot.
    awh, awe = attn_w[:N], attn_w[N:]
    xw = jnp.concatenate([awh, l1_w], axis=1)                 # (N, Ma+Ml)
    xb = jnp.concatenate([attn_b, l1_b]).reshape(1, Ma + Ml)  # (1, Ma+Ml)
    l2b = l2_b.reshape(1, O)

    # 8-aligned padded sequence length for the in-kernel halo scratch.
    Sp_pad = -(-(S + 2 * w_size) // 8) * 8

    def wspec(arr):
        nd = arr.ndim
        return pl.BlockSpec(arr.shape, lambda b, _nd=nd: (0,) * _nd)

    slab = pl.pallas_call(
        functools.partial(_frame_stack_kernel, w_size=w_size),
        out_shape=jax.ShapeDtypeStruct((Bp, S, OUT_LANES), jnp.float32),
        grid=(Bp // TB,),
        in_specs=[
            pl.BlockSpec((TB, S, N), lambda b: (b, 0, 0)),    # x
            pl.BlockSpec((TB, S, N), lambda b: (b, 0, 0)),    # encoder outputs
            wspec(xw), wspec(xb), wspec(awe), wspec(v_w),
            wspec(l2_w), wspec(l2b),
        ],
        out_specs=pl.BlockSpec((TB, S, OUT_LANES), lambda b: (b, 0, 0)),
        scratch_shapes=[pltpu.VMEM((TB, Sp_pad, N), jnp.float32)],
        compiler_params=pltpu.CompilerParams(
            dimension_semantics=("parallel",)),   # batch tiles are independent
    )(xf, ef, xw, xb, awe, v_w, l2_w, l2b)

    out = slab[:B, :, :O]
    a = slab[:B, :, O:O + W]
    # Match PyTorch return shapes: a has the unsqueeze(2) -> (B, S, 1, W)
    return out, a[:, :, None, :]


def reference(x, encoder_outputs, params, w_size):
    """Pure-JAX mirror of the PyTorch forward for correctness checking."""
    attn_w, attn_b, v_w, l1_w, l1_b, l2_w, l2_b = params
    B, S, N = encoder_outputs.shape
    W = 2 * w_size + 1
    padded = jnp.pad(encoder_outputs, ((0, 0), (w_size, w_size), (0, 0)))
    windowed = jnp.stack([padded[:, i:i + S, :] for i in range(W)], axis=2)
    hidden = jnp.broadcast_to(x[:, :, None, :], (B, S, W, N))
    cat = jnp.concatenate([hidden, windowed], axis=-1)
    energy = jnp.tanh(cat @ attn_w + attn_b)
    attention = jnp.squeeze(energy @ v_w, -1)
    a = jax.nn.softmax(attention, -1)
    weighted = jnp.einsum('bsw,bswn->bsn', a, windowed)
    h1 = jax.nn.relu(x @ l1_w + l1_b)
    out = jax.nn.sigmoid(jnp.concatenate([h1, weighted], -1) @ l2_w + l2_b)
    return out, a[:, :, None, :]


if __name__ == "__main__":
    B, S = 2, 8
    model_size = 32
    output_features = 16
    w_size = 2
    N = N_BINS

    key = jax.random.PRNGKey(0)
    ks = jax.random.split(key, 9)
    x = jax.random.normal(ks[0], (B, S, N), dtype=jnp.float32)
    encoder_outputs = jax.random.normal(ks[1], (B, S, N), dtype=jnp.float32)

    # Deterministic synthetic parameters (stored as (in, out) for direct matmul).
    attn_w = 0.1 * jax.random.normal(ks[2], (N + N, model_size), dtype=jnp.float32)
    attn_b = 0.1 * jax.random.normal(ks[3], (model_size,), dtype=jnp.float32)
    v_w = 0.1 * jax.random.normal(ks[4], (model_size, 1), dtype=jnp.float32)
    l1_w = 0.1 * jax.random.normal(ks[5], (N, model_size), dtype=jnp.float32)
    l1_b = 0.1 * jax.random.normal(ks[6], (model_size,), dtype=jnp.float32)
    l2_w = 0.1 * jax.random.normal(ks[7], (model_size + N, output_features),
                                   dtype=jnp.float32)
    l2_b = 0.1 * jax.random.normal(ks[8], (output_features,), dtype=jnp.float32)
    params = (attn_w, attn_b, v_w, l1_w, l1_b, l2_w, l2_b)

    out, a = frame_stack_with_attn(x, encoder_outputs, params, w_size)
    out = jax.block_until_ready(out)
    a = jax.block_until_ready(a)

    out_ref, a_ref = reference(x, encoder_outputs, params, w_size)
    assert out.shape == (B, S, output_features)
    assert a.shape == (B, S, 1, 2 * w_size + 1)
    assert jnp.allclose(out, out_ref, atol=1e-5, rtol=1e-5)
    assert jnp.allclose(a, a_ref, atol=1e-5, rtol=1e-5)

    print("KERNEL_OK")
</pallas_src>

<mosaic_0001>
module attributes {stable_mosaic.version = 11 : i64} {
  func.func @_frame_stack_kernel(%arg0: i32, %arg1: memref<1x8x32xf32, #tpu.memory_space<vmem>>, %arg2: memref<1x8x32xf32, #tpu.memory_space<vmem>>, %arg3: memref<32x64xf32, #tpu.memory_space<vmem>>, %arg4: memref<1x64xf32, #tpu.memory_space<vmem>>, %arg5: memref<32x32xf32, #tpu.memory_space<vmem>>, %arg6: memref<32x1xf32, #tpu.memory_space<vmem>>, %arg7: memref<64x16xf32, #tpu.memory_space<vmem>>, %arg8: memref<1x16xf32, #tpu.memory_space<vmem>>, %arg9: memref<1x8x32xf32, #tpu.memory_space<vmem>>, %arg10: memref<1x16x32xf32, #tpu.memory_space<vmem>>) attributes {dimension_semantics = [#tpu.dimension_semantics<parallel>], iteration_bounds = array<i64: 2>, scalar_prefetch = 0 : i64, scratch_operands = 1 : i64, tpu.core_type = #tpu.core_type<tc>, window_params = [{transform_indices = @transform_0, window_bounds = array<i64: 1, 8, 32>}, {transform_indices = @transform_1, window_bounds = array<i64: 1, 8, 32>}, {pipeline_mode = #tpu.pipeline_mode<synchronous>, transform_indices = @transform_2, window_bounds = array<i64: 32, 64>}, {pipeline_mode = #tpu.pipeline_mode<synchronous>, transform_indices = @transform_3, window_bounds = array<i64: 1, 64>}, {pipeline_mode = #tpu.pipeline_mode<synchronous>, transform_indices = @transform_4, window_bounds = array<i64: 32, 32>}, {pipeline_mode = #tpu.pipeline_mode<synchronous>, transform_indices = @transform_5, window_bounds = array<i64: 32, 1>}, {pipeline_mode = #tpu.pipeline_mode<synchronous>, transform_indices = @transform_6, window_bounds = array<i64: 64, 16>}, {pipeline_mode = #tpu.pipeline_mode<synchronous>, transform_indices = @transform_7, window_bounds = array<i64: 1, 16>}, {transform_indices = @transform_8, window_bounds = array<i64: 1, 8, 32>}]} {
    %c0 = arith.constant 0 : index
    %c0_0 = arith.constant 0 : index
    %c0_1 = arith.constant 0 : index
    %0 = vector.load %arg1[%c0, %c0_0, %c0_1] : memref<1x8x32xf32, #tpu.memory_space<vmem>>, vector<1x8x32xf32>
    %1 = vector.shape_cast %0 : vector<1x8x32xf32> to vector<8x32xf32>
    %cst = arith.constant 0.000000e+00 : f32
    %2 = vector.broadcast %cst : f32 to vector<1x16x32xf32>
    %c0_2 = arith.constant 0 : index
    %c0_3 = arith.constant 0 : index
    %c0_4 = arith.constant 0 : index
    %3 = vector.load %arg10[%c0_2, %c0_3, %c0_4] : memref<1x16x32xf32, #tpu.memory_space<vmem>>, vector<1x16x32xf32>
    tpu.vector_store %arg10[%c0_2, %c0_3, %c0_4], %2 {strides = array<i32>} : memref<1x16x32xf32, #tpu.memory_space<vmem>>, vector<1x16x32xf32>,
    %c0_5 = arith.constant 0 : index
    %c0_6 = arith.constant 0 : index
    %c0_7 = arith.constant 0 : index
    %4 = vector.load %arg2[%c0_5, %c0_6, %c0_7] : memref<1x8x32xf32, #tpu.memory_space<vmem>>, vector<1x8x32xf32>
    %c0_8 = arith.constant 0 : index
    %c2 = arith.constant 2 : index
    %c0_9 = arith.constant 0 : index
    %5 = vector.load %arg10[%c0_8, %c2, %c0_9] : memref<1x16x32xf32, #tpu.memory_space<vmem>>, vector<1x8x32xf32>
    tpu.vector_store %arg10[%c0_8, %c2, %c0_9], %4 {strides = array<i32>} : memref<1x16x32xf32, #tpu.memory_space<vmem>>, vector<1x8x32xf32>,
    %c0_10 = arith.constant 0 : index
    %c0_11 = arith.constant 0 : index
    %c0_12 = arith.constant 0 : index
    %6 = vector.load %arg10[%c0_10, %c0_11, %c0_12] : memref<1x16x32xf32, #tpu.memory_space<vmem>>, vector<1x16x32xf32>
    %c0_13 = arith.constant 0 : index
    %c0_14 = arith.constant 0 : index
    %7 = vector.load %arg3[%c0_13, %c0_14] : memref<32x64xf32, #tpu.memory_space<vmem>>, vector<32x64xf32>
    %cst_15 = arith.constant dense<0.000000e+00> : vector<8x64xf32>
    %8 = tpu.matmul %1, %7, %cst_15 {dimension_numbers = #tpu.dot_dimension_numbers<[1], [0], [0], [1], [0, 0, 1, 1], [], []>} : vector<8x32xf32>, vector<32x64xf32>, vector<8x64xf32> -> vector<8x64xf32>
    %c0_16 = arith.constant 0 : index
    %c0_17 = arith.constant 0 : index
    %9 = vector.load %arg4[%c0_16, %c0_17] : memref<1x64xf32, #tpu.memory_space<vmem>>, vector<1x64xf32>
    %10 = vector.broadcast %9 : vector<1x64xf32> to vector<8x64xf32>
    %11 = arith.addf %8, %10 : vector<8x64xf32>
    %12 = vector.extract_strided_slice %11 {offsets = [0, 0], sizes = [8, 32], strides = [1, 1]} : vector<8x64xf32> to vector<8x32xf32>
    %13 = vector.extract_strided_slice %11 {offsets = [0, 32], sizes = [8, 32], strides = [1, 1]} : vector<8x64xf32> to vector<8x32xf32>
    %cst_18 = arith.constant 0.000000e+00 : f32
    %14 = vector.broadcast %cst_18 : f32 to vector<8x32xf32>
    %15 = arith.maximumf %13, %14 : vector<8x32xf32>
    %16 = vector.shape_cast %6 : vector<1x16x32xf32> to vector<16x32xf32>
    %c0_19 = arith.constant 0 : index
    %c0_20 = arith.constant 0 : index
    %17 = vector.load %arg5[%c0_19, %c0_20] : memref<32x32xf32, #tpu.memory_space<vmem>>, vector<32x32xf32>
    %cst_21 = arith.constant dense<0.000000e+00> : vector<16x32xf32>
    %18 = tpu.matmul %16, %17, %cst_21 {dimension_numbers = #tpu.dot_dimension_numbers<[1], [0], [0], [1], [0, 0, 1, 1], [], []>} : vector<16x32xf32>, vector<32x32xf32>, vector<16x32xf32> -> vector<16x32xf32>
    %19 = vector.shape_cast %18 : vector<16x32xf32> to vector<1x16x32xf32>
    %c0_22 = arith.constant 0 : index
    %c0_23 = arith.constant 0 : index
    %20 = vector.load %arg6[%c0_22, %c0_23] : memref<32x1xf32, #tpu.memory_space<vmem>>, vector<32x1xf32>
    %21 = vector.extract_strided_slice %19 {offsets = [0, 0, 0], sizes = [1, 8, 32], strides = [1, 1, 1]} : vector<1x16x32xf32> to vector<1x8x32xf32>
    %22 = vector.shape_cast %21 : vector<1x8x32xf32> to vector<8x32xf32>
    %23 = arith.addf %12, %22 : vector<8x32xf32>
    %24 = math.tanh %23 : vector<8x32xf32>
    %cst_24 = arith.constant dense<0.000000e+00> : vector<8x1xf32>
    %25 = tpu.matmul %24, %20, %cst_24 {dimension_numbers = #tpu.dot_dimension_numbers<[1], [0], [0], [1], [0, 0, 1, 1], [], []>} : vector<8x32xf32>, vector<32x1xf32>, vector<8x1xf32> -> vector<8x1xf32>
    %26 = vector.extract_strided_slice %19 {offsets = [0, 1, 0], sizes = [1, 8, 32], strides = [1, 1, 1]} : vector<1x16x32xf32> to vector<1x8x32xf32>
    %27 = vector.shape_cast %26 : vector<1x8x32xf32> to vector<8x32xf32>
    %28 = arith.addf %12, %27 : vector<8x32xf32>
    %29 = math.tanh %28 : vector<8x32xf32>
    %cst_25 = arith.constant dense<0.000000e+00> : vector<8x1xf32>
    %30 = tpu.matmul %29, %20, %cst_25 {dimension_numbers = #tpu.dot_dimension_numbers<[1], [0], [0], [1], [0, 0, 1, 1], [], []>} : vector<8x32xf32>, vector<32x1xf32>, vector<8x1xf32> -> vector<8x1xf32>
    %31 = vector.extract_strided_slice %19 {offsets = [0, 2, 0], sizes = [1, 8, 32], strides = [1, 1, 1]} : vector<1x16x32xf32> to vector<1x8x32xf32>
    %32 = vector.shape_cast %31 : vector<1x8x32xf32> to vector<8x32xf32>
    %33 = arith.addf %12, %32 : vector<8x32xf32>
    %34 = math.tanh %33 : vector<8x32xf32>
    %cst_26 = arith.constant dense<0.000000e+00> : vector<8x1xf32>
    %35 = tpu.matmul %34, %20, %cst_26 {dimension_numbers = #tpu.dot_dimension_numbers<[1], [0], [0], [1], [0, 0, 1, 1], [], []>} : vector<8x32xf32>, vector<32x1xf32>, vector<8x1xf32> -> vector<8x1xf32>
    %36 = vector.extract_strided_slice %19 {offsets = [0, 3, 0], sizes = [1, 8, 32], strides = [1, 1, 1]} : vector<1x16x32xf32> to vector<1x8x32xf32>
    %37 = vector.shape_cast %36 : vector<1x8x32xf32> to vector<8x32xf32>
    %38 = arith.addf %12, %37 : vector<8x32xf32>
    %39 = math.tanh %38 : vector<8x32xf32>
    %cst_27 = arith.constant dense<0.000000e+00> : vector<8x1xf32>
    %40 = tpu.matmul %39, %20, %cst_27 {dimension_numbers = #tpu.dot_dimension_numbers<[1], [0], [0], [1], [0, 0, 1, 1], [], []>} : vector<8x32xf32>, vector<32x1xf32>, vector<8x1xf32> -> vector<8x1xf32>
    %41 = vector.extract_strided_slice %19 {offsets = [0, 4, 0], sizes = [1, 8, 32], strides = [1, 1, 1]} : vector<1x16x32xf32> to vector<1x8x32xf32>
    %42 = vector.shape_cast %41 : vector<1x8x32xf32> to vector<8x32xf32>
    %43 = arith.addf %12, %42 : vector<8x32xf32>
    %44 = math.tanh %43 : vector<8x32xf32>
    %cst_28 = arith.constant dense<0.000000e+00> : vector<8x1xf32>
    %45 = tpu.matmul %44, %20, %cst_28 {dimension_numbers = #tpu.dot_dimension_numbers<[1], [0], [0], [1], [0, 0, 1, 1], [], []>} : vector<8x32xf32>, vector<32x1xf32>, vector<8x1xf32> -> vector<8x1xf32>
    %46 = tpu.concatenate %25, %30, %35, %40, %45 in 1 : vector<8x1xf32>, vector<8x1xf32>, vector<8x1xf32>, vector<8x1xf32>, vector<8x1xf32> -> vector<8x5xf32>
    %cst_29 = arith.constant dense<0xFF800000> : vector<8xf32>
    %47 = vector.multi_reduction <maximumf>, %46, %cst_29 [1] : vector<8x5xf32> to vector<8xf32>
    %48 = vector.shape_cast %47 : vector<8xf32> to vector<8x1xf32>
    %49 = vector.broadcast %48 : vector<8x1xf32> to vector<8x5xf32>
    %50 = arith.subf %46, %49 : vector<8x5xf32>
    %51 = math.exp %50 : vector<8x5xf32>
    %cst_30 = arith.constant dense<0.000000e+00> : vector<8xf32>
    %52 = vector.multi_reduction <add>, %51, %cst_30 [1] : vector<8x5xf32> to vector<8xf32>
    %53 = vector.shape_cast %52 : vector<8xf32> to vector<8x1xf32>
    %54 = tpu.reciprocal %53 : vector<8x1xf32> -> vector<8x1xf32>
    %55 = vector.broadcast %54 : vector<8x1xf32> to vector<8x5xf32>
    %56 = arith.mulf %51, %55 : vector<8x5xf32>
    %cst_31 = arith.constant 0.000000e+00 : f32
    %57 = vector.broadcast %cst_31 : f32 to vector<8x32xf32>
    %58 = vector.extract_strided_slice %56 {offsets = [0, 0], sizes = [8, 1], strides = [1, 1]} : vector<8x5xf32> to vector<8x1xf32>
    %59 = vector.extract_strided_slice %6 {offsets = [0, 0, 0], sizes = [1, 8, 32], strides = [1, 1, 1]} : vector<1x16x32xf32> to vector<1x8x32xf32>
    %60 = vector.shape_cast %59 : vector<1x8x32xf32> to vector<8x32xf32>
    %61 = vector.broadcast %58 : vector<8x1xf32> to vector<8x32xf32>
    %62 = arith.mulf %61, %60 : vector<8x32xf32>
    %63 = arith.addf %57, %62 : vector<8x32xf32>
    %64 = vector.extract_strided_slice %56 {offsets = [0, 1], sizes = [8, 1], strides = [1, 1]} : vector<8x5xf32> to vector<8x1xf32>
    %65 = vector.extract_strided_slice %6 {offsets = [0, 1, 0], sizes = [1, 8, 32], strides = [1, 1, 1]} : vector<1x16x32xf32> to vector<1x8x32xf32>
    %66 = vector.shape_cast %65 : vector<1x8x32xf32> to vector<8x32xf32>
    %67 = vector.broadcast %64 : vector<8x1xf32> to vector<8x32xf32>
    %68 = arith.mulf %67, %66 : vector<8x32xf32>
    %69 = arith.addf %63, %68 : vector<8x32xf32>
    %70 = vector.extract_strided_slice %56 {offsets = [0, 2], sizes = [8, 1], strides = [1, 1]} : vector<8x5xf32> to vector<8x1xf32>
    %71 = vector.extract_strided_slice %6 {offsets = [0, 2, 0], sizes = [1, 8, 32], strides = [1, 1, 1]} : vector<1x16x32xf32> to vector<1x8x32xf32>
    %72 = vector.shape_cast %71 : vector<1x8x32xf32> to vector<8x32xf32>
    %73 = vector.broadcast %70 : vector<8x1xf32> to vector<8x32xf32>
    %74 = arith.mulf %73, %72 : vector<8x32xf32>
    %75 = arith.addf %69, %74 : vector<8x32xf32>
    %76 = vector.extract_strided_slice %56 {offsets = [0, 3], sizes = [8, 1], strides = [1, 1]} : vector<8x5xf32> to vector<8x1xf32>
    %77 = vector.extract_strided_slice %6 {offsets = [0, 3, 0], sizes = [1, 8, 32], strides = [1, 1, 1]} : vector<1x16x32xf32> to vector<1x8x32xf32>
    %78 = vector.shape_cast %77 : vector<1x8x32xf32> to vector<8x32xf32>
    %79 = vector.broadcast %76 : vector<8x1xf32> to vector<8x32xf32>
    %80 = arith.mulf %79, %78 : vector<8x32xf32>
    %81 = arith.addf %75, %80 : vector<8x32xf32>
    %82 = vector.extract_strided_slice %56 {offsets = [0, 4], sizes = [8, 1], strides = [1, 1]} : vector<8x5xf32> to vector<8x1xf32>
    %83 = vector.extract_strided_slice %6 {offsets = [0, 4, 0], sizes = [1, 8, 32], strides = [1, 1, 1]} : vector<1x16x32xf32> to vector<1x8x32xf32>
    %84 = vector.shape_cast %83 : vector<1x8x32xf32> to vector<8x32xf32>
    %85 = vector.broadcast %82 : vector<8x1xf32> to vector<8x32xf32>
    %86 = arith.mulf %85, %84 : vector<8x32xf32>
    %87 = arith.addf %81, %86 : vector<8x32xf32>
    %88 = tpu.concatenate %15, %87 in 1 : vector<8x32xf32>, vector<8x32xf32> -> vector<8x64xf32>
    %c0_32 = arith.constant 0 : index
    %c0_33 = arith.constant 0 : index
    %89 = vector.load %arg7[%c0_32, %c0_33] : memref<64x16xf32, #tpu.memory_space<vmem>>, vector<64x16xf32>
    %cst_34 = arith.constant dense<0.000000e+00> : vector<8x16xf32>
    %90 = tpu.matmul %88, %89, %cst_34 {dimension_numbers = #tpu.dot_dimension_numbers<[1], [0], [0], [1], [0, 0, 1, 1], [], []>} : vector<8x64xf32>, vector<64x16xf32>, vector<8x16xf32> -> vector<8x16xf32>
    %c0_35 = arith.constant 0 : index
    %c0_36 = arith.constant 0 : index
    %91 = vector.load %arg8[%c0_35, %c0_36] : memref<1x16xf32, #tpu.memory_space<vmem>>, vector<1x16xf32>
    %92 = vector.broadcast %91 : vector<1x16xf32> to vector<8x16xf32>
    %93 = arith.addf %90, %92 : vector<8x16xf32>
    %cst_37 = arith.constant 5.000000e-01 : f32
    %94 = vector.broadcast %cst_37 : f32 to vector<8x16xf32>
    %95 = arith.mulf %94, %93 : vector<8x16xf32>
    %96 = math.tanh %95 : vector<8x16xf32>
    %cst_38 = arith.constant 1.000000e+00 : f32
    %97 = vector.broadcast %cst_38 : f32 to vector<8x16xf32>
    %98 = arith.addf %96, %97 : vector<8x16xf32>
    %cst_39 = arith.constant 5.000000e-01 : f32
    %99 = vector.broadcast %cst_39 : f32 to vector<8x16xf32>
    %100 = arith.mulf %99, %98 : vector<8x16xf32>
    %cst_40 = arith.constant 0.000000e+00 : f32
    %101 = vector.broadcast %cst_40 : f32 to vector<8x11xf32>
    %102 = tpu.concatenate %100, %56, %101 in 1 : vector<8x16xf32>, vector<8x5xf32>, vector<8x11xf32> -> vector<8x32xf32>
    %103 = vector.shape_cast %102 : vector<8x32xf32> to vector<1x8x32xf32>
    %c0_41 = arith.constant 0 : index
    %c0_42 = arith.constant 0 : index
    %c0_43 = arith.constant 0 : index
    %104 = vector.load %arg9[%c0_41, %c0_42, %c0_43] : memref<1x8x32xf32, #tpu.memory_space<vmem>>, vector<1x8x32xf32>
    tpu.vector_store %arg9[%c0_41, %c0_42, %c0_43], %103 {strides = array<i32>} : memref<1x8x32xf32, #tpu.memory_space<vmem>>, vector<1x8x32xf32>,
    return
  }
  func.func @transform_0(%arg0: i32) -> (i32, i32, i32) {
    %c0_i32 = arith.constant 0 : i32
    %c0_i32_0 = arith.constant 0 : i32
    %c0_i32_1 = arith.constant 0 : i32
    return %arg0, %c0_i32, %c0_i32_0 : i32, i32, i32
  }
  func.func @transform_1(%arg0: i32) -> (i32, i32, i32) {
    %c0_i32 = arith.constant 0 : i32
    %c0_i32_0 = arith.constant 0 : i32
    %c0_i32_1 = arith.constant 0 : i32
    return %arg0, %c0_i32, %c0_i32_0 : i32, i32, i32
  }
  func.func @transform_2(%arg0: i32) -> (i32, i32) {
    %c0_i32 = arith.constant 0 : i32
    %c0_i32_0 = arith.constant 0 : i32
    %c0_i32_1 = arith.constant 0 : i32
    return %c0_i32, %c0_i32_0 : i32, i32
  }
  func.func @transform_3(%arg0: i32) -> (i32, i32) {
    %c0_i32 = arith.constant 0 : i32
    %c0_i32_0 = arith.constant 0 : i32
    %c0_i32_1 = arith.constant 0 : i32
    return %c0_i32, %c0_i32_0 : i32, i32
  }
  func.func @transform_4(%arg0: i32) -> (i32, i32) {
    %c0_i32 = arith.constant 0 : i32
    %c0_i32_0 = arith.constant 0 : i32
    %c0_i32_1 = arith.constant 0 : i32
    return %c0_i32, %c0_i32_0 : i32, i32
  }
  func.func @transform_5(%arg0: i32) -> (i32, i32) {
    %c0_i32 = arith.constant 0 : i32
    %c0_i32_0 = arith.constant 0 : i32
    %c0_i32_1 = arith.constant 0 : i32
    return %c0_i32, %c0_i32_0 : i32, i32
  }
  func.func @transform_6(%arg0: i32) -> (i32, i32) {
    %c0_i32 = arith.constant 0 : i32
    %c0_i32_0 = arith.constant 0 : i32
    %c0_i32_1 = arith.constant 0 : i32
    return %c0_i32, %c0_i32_0 : i32, i32
  }
  func.func @transform_7(%arg0: i32) -> (i32, i32) {
    %c0_i32 = arith.constant 0 : i32
    %c0_i32_0 = arith.constant 0 : i32
    %c0_i32_1 = arith.constant 0 : i32
    return %c0_i32, %c0_i32_0 : i32, i32
  }
  func.func @transform_8(%arg0: i32) -> (i32, i32, i32) {
    %c0_i32 = arith.constant 0 : i32
    %c0_i32_0 = arith.constant 0 : i32
    %c0_i32_1 = arith.constant 0 : i32
    return %arg0, %c0_i32, %c0_i32_0 : i32, i32, i32
  }
}

</mosaic_0001>

<bundles_post_ra>
// kernel: tpu_custom_call.1
= control target key start
LH: loop header
LB: loop body
LE: loop exit
PB: predicated region body
PF: predicated region fallthrough
CT: control target
= control target key end

     0   :  { %13 = vsyncpa [#allocation4], 0  ;;  %s1848_s0 = inlined_call_operand.vmem [shape: f32[2,8,32], index: 0, kind: input, shape index: {}]   ;;  %s1849_s1 = inlined_call_operand.vmem [shape: f32[2,8,32], index: 1, kind: input, shape index: {}]   ;;  %s1850_s2 = inlined_call_operand.vmem [shape: f32[32,64], index: 2, kind: input, shape index: {}]   ;;  %s1851_s3 = inlined_call_operand.vmem [shape: f32[1,64], index: 3, kind: input, shape index: {}]   ;;  %s1852_s4 = inlined_call_operand.vmem [shape: f32[32,32], index: 4, kind: input, shape index: {}]   ;;  %s1853_s5 = inlined_call_operand.vmem [shape: f32[32,1], index: 5, kind: input, shape index: {}]   ;;  %s1854_s6 = inlined_call_operand.vmem [shape: f32[64,16], index: 6, kind: input, shape index: {}]   ;;  %s1855_s7 = inlined_call_operand.vmem [shape: f32[1,16], index: 7, kind: input, shape index: {}]   ;;  %s1856_s8 = inlined_call_operand.hbm [shape: f32[2,8,32], index: 8, kind: output, shape index: {}]  }
   0x1   :  { %15 = vsyncpa [#allocation4 + $0x1], 0  ;;  %s1595_s27 = smov 0   ;;  %s1597_s28 = smov 0  }
   0x2   :  { %s1599_s29 = smov 0   ;;  %s1601_s30 = smov 0  }
   0x3 LB: > { %s1616_s9 = sadd.s32 4294967295, %s1532_s30   ;;  %s1175_s10 = sadd.s32 4294967294, %s1532_s30   ;;  %s1532_s30 = sphi %s1601_s30, %s1862_s30   ;;  %s1528_s29 = sphi %s1599_s29, %s1861_s29   ;;  %s1524_s28 = sphi %s1597_s28, %s1860_s28   ;;  %s1520_s27 = sphi %s1595_s27, %s1859_s27  }
   0x4   : > { %s1620_s11 = sadd.s32 1, %s1532_s30   ;;  %s206_s12 = sadd.s32 1, %s1528_s29 }
   0x5   : > { %s203_s13 = ssub.s32 %s1532_s30, %s1620_s11  ;;  %p216_p0 = scmp.ne.s32.totalorder %s1528_s29, %s1524_s28 }
   0x6   : > { %p204_p1 = scmp.eq.s32.totalorder %s203_s13, 0  ;;  %p217_p2 = scmp.eq.s32.totalorder %s1616_s9, 1 }
   0x7   : > { %p222_p3 = scmp.ne.s32.totalorder %s1524_s28, %s1520_s27  ;;  %p223_p4 = scmp.eq.s32.totalorder %s1175_s10, 1 }
   0x8   : > { %s1631_s14 = scalar_select %p204_p1, %s1528_s29, %s206_s12  }
   0x9   : > { %p1633_p5 = por %p217_p2, %p216_p0  ;;  %p1637_p6 = por %p223_p4, %p222_p3 }
   0xa   : > { %p1178_p7 = scmp.ge.s32.totalorder %s1532_s30, 1  ;;  %p273_p8 = scmp.lt.s32.totalorder %s1532_s30, 3 }
   0xc   : > { %p274_p9 = pnand %p1178_p7, %p273_p8 }
   0xd   : > { %v326_v0 = vld [vmem:[%s1850_s2] sm:$0xff] (!%p274_p9)  ;;  %v327_v1 = vld [vmem:[%s1850_s2 + $0x8] sm:$0xff] (!%p274_p9)  ;;  %v1534_v3 = vmov (!%p274_p9), 0.0|0.0   ;;  %v328_v6 = vld [vmem:[%s1850_s2 + $0x10] sm:$0xff] (!%p274_p9)  ;;  %vm1535_vm0 = vmmov (!%p274_p9), 0   ;;  %v1536_v8 = vmov (!%p274_p9), 0.0  }
   0xe   : > { %277 = sbr.rel (%p274_p9) target bundleno = 1430 (0x596), region = 52  ;;  %v411_v2 = vld [vmem:[%s1852_s4] sm:$0xff] (!%p274_p9)  ;;  %1338 = vmatprep.subr.bf16.mxu0 (!%p274_p9), %v1534_v3  ;;  %v1339_v4 = vpack.c.bf16 (!%p274_p9), %v327_v1, %v326_v0  ;;  %v412_v5 = vld [vmem:[%s1852_s4 + $0x8] sm:$0xff] (!%p274_p9)  ;;  %v329_v7 = vld [vmem:[%s1850_s2 + $0x18] sm:$0xff] (!%p274_p9)  ;;  %1250 = vmatprep.mubr.msk.f32.mxu0 (!%p274_p9), %vm1535_vm0, %v1536_v8  ;;  %p310_p10 = scmp.lt.s32.totalorder (!%p274_p9), %s1616_s9, 1  ;;  %vm319_vm1 = vcmask (!%p274_p9), 261120  }
   0xf   : > { %v1344_v9 = vpack.c.bf16 (!%p274_p9), %v412_v5, %v411_v2  ;;  %v413_v10 = vld [vmem:[%s1852_s4 + $0x10] sm:$0xff] (!%p274_p9)  ;;  %v414_v11 = vld [vmem:[%s1852_s4 + $0x18] sm:$0xff] (!%p274_p9)  ;;  %320 = vst.msk [vmem:[#allocation2] sm:$0xff] (!%p274_p9), %vm319_vm1, %v1536_v8  ;;  %321 = vst.msk [vmem:[#allocation2 + $0x8] sm:$0xff] (!%p274_p9), %vm319_vm1, %v1536_v8  ;;  %v1342_v12 = vpack.c.bf16 (!%p274_p9), %v329_v7, %v328_v6  ;;  %vm577_vm2 = vcmask (!%p274_p9), 1046528   ;;  %vm657_vm3 = vcmask (!%p274_p9), 1045504  }
  0x10   : > { %1340 = vmatpush3.bf16.msra.mxu0 (!%p274_p9), %v1339_v4  ;;  %v1348_v13 = vpack.c.bf16 (!%p274_p9), %v414_v11, %v413_v10  ;;  %v496_v18 = vld [vmem:[%s1853_s5] sm:$0xff] (!%p274_p9)  ;;  %v497_v19 = vld [vmem:[%s1853_s5 + $0x8] sm:$0xff] (!%p274_p9)  ;;  %v498_v21 = vld [vmem:[%s1853_s5 + $0x10] sm:$0xff] (!%p274_p9)  ;;  %vm737_vm4 = vcmask (!%p274_p9), 1044480   ;;  %vm817_vm5 = vcmask (!%p274_p9), 1043456   ;;  %s1537_s25 = smov (!%p274_p9), 1  }
  0x11   : > { %1345 = vmatprep.subr.bf16.mxu1 (!%p274_p9), %v1344_v9  ;;  %1341 = vmatprep.subr.bf16.mxu0 (!%p274_p9), %v1534_v3  ;;  %v1353_v20 = vpack.c.bf16 (!%p274_p9), %v497_v19, %v496_v18  ;;  %v499_v22 = vld [vmem:[%s1853_s5 + $0x18] sm:$0xff] (!%p274_p9)  ;;  %v1182_v26 = vld [vmem:[%s1851_s3] ss:$0 sm:$0xff] (!%p274_p9)  ;;  %s1538_s26 = smov (!%p274_p9), 2   ;;  %s1540_s12 = smov (!%p274_p9), 4   ;;  %vm913_vm6 = vcmask (!%p274_p9), 7168  }
  0x12   : > { %1347 = vmatpush3.bf16.msra.mxu1 (!%p274_p9), %v1344_v9  ;;  %v1356_v23 = vpack.c.bf16 (!%p274_p9), %v499_v22, %v498_v21  ;;  %vm915_vm7 = vcmask (!%p274_p9), 15360   ;;  %vm917_vm8 = vcmask (!%p274_p9), 23552   ;;  %vm919_vm9 = vcmask (!%p274_p9), 31744   ;;  %s1546_s13 = smov (!%p274_p9), 96  }
  0x13   : > { %1349 = vmatprep.subr.bf16.mxu1 (!%p274_p9), %v1348_v13  ;;  %vm921_vm10 = vcmask (!%p274_p9), 39936   ;;  %v1544_v21 = vmov (!%p274_p9), 4   ;;  %v1545_v22 = vmov (!%p274_p9), 3   ;;  %vm1004_vm11 = vcmask (!%p274_p9), 523264  }
  0x14   : > { %1343 = vmatpush3.bf16.msra.mxu0 (!%p274_p9), %v1342_v12  ;;  %vm1085_vm12 = vcmask (!%p274_p9), 130048   ;;  %vm1087_vm13 = vcmask (!%p274_p9), 171008  }
  0x15   : > { %s311_s20 = scalar_select %p310_p10, %s1616_s9, 1  ;;  %1352 = vmatprep.subr.bf16.mxu0 %v1534_v3 }
  0x16   : > { %1351 = vmatpush3.bf16.msra.mxu1 %v1348_v13  ;;  %v1541_v13 = vmov 1  }
  0x17   : > { %s1180_s21 = sshll.u32 %s311_s20, 3  ;;  %1358 = vmatprep.subr.bf16.mxu1 %v1534_v3  ;;  %1449 = vset.pattern.permute.xlu1 %v1541_v13  ;;  %s1547_s20 = smov 32  }
  0x18   : > { %s313_s24 = scalar_lea.vmem %s1848_s0, %s1180_s21  ;;  %s317_s10 = scalar_lea.vmem %s1849_s1, %s1180_s21 }
  0x19   : > { %v318_v14 = vld [vmem:[%s313_s24] sm:$0xff]  ;;  %s1548_s21 = smov 16   ;;  %s307_s24 = sand.u32 1, %s1524_s28  }
  0x1a   : > { %v322_v15 = vld [vmem:[%s317_s10] sm:$0xff]  ;;  %1251 = vmatmul.mubr.msk.f32.vlgmr.msra.gmra.mrb[0].mxu0 %vm319_vm1, %v318_v14  ;;  %s1539_s10 = smov 3   ;;  %v1542_v14 = vmov 0  }
  0x1b   : > { %323 = vst.msk [vmem:[#allocation2 + $0x2] sm:$0xff] %vm319_vm1, %v322_v15  ;;  %1272 = vmatprep.mubr.msk.f32.mxu0 %vm1535_vm0, %v1536_v8  ;;  %1354 = vmatpush3.bf16.msra.mxu0 %v1353_v20 }
  0x1c   : > { %1355 = vmatprep.subr.bf16.mxu0 %v1534_v3  ;;  %1448 = vset.pattern.permute.xlu0 %v1542_v14 }
  0x1f   : > { %1357 = vmatpush3.bf16.msra.mxu0 %v1356_v23 }
  0x20   : > { %1364 = vmatprep.subr.bf16.mxu0 %v1534_v3 }
  0x22   : > { %v1689_v16 = vld [vmem:[#allocation2] sm:$0xff]  ;;  %v1691_v17 = vld [vmem:[#allocation2 + $0x8] sm:$0xff] }
  0x23   : > { %1261 = vmatprep.mubr.msk.f32.mxu1 %vm319_vm1, %v1689_v16 }
  0x24   : > { %1262 = vmatmul.mubr.msk.f32.vlgmr.msra.gmra.mrb[0].mxu1 %vm319_vm1, %v1691_v17 }
  0x25   : > { %1283 = vmatprep.mubr.msk.f32.mxu1 %vm1535_vm0, %v1536_v8  ;;  %1360 = vmatpush3.bf16.msra.mxu1 %v1353_v20 }
  0x26   : > { %1361 = vmatprep.subr.bf16.mxu1 %v1534_v3 }
  0x29   : > { %1363 = vmatpush3.bf16.msra.mxu1 %v1356_v23 }
  0x2a   : > { %1370 = vmatprep.subr.bf16.mxu1 %v1534_v3 }
  0xed   : > { %v406_v24 = vpop.f32.mrb[0].mxu0 }
  0xee   : > { %v1252_v25 = vpop.f32.mrb[1].mxu0  ;;  %v1718_v27 = vadd.f32 %v1182_v26, %v406_v24  ;;  %v989_v24 = vld [vmem:[%s1854_s6] sm:$0xff]  ;;  %v991_v26 = vld [vmem:[%s1854_s6 + $0x10] sm:$0xff] }
  0xef   : > { %v990_v25 = vld [vmem:[%s1854_s6 + $0x8] sm:$0xff] }
  0xf7   : > { %v1263_v28 = vpop.f32.mrb[0].mxu1 }
  0xf8   : > { %v579_v29 = vrot.slane %v1263_v28, 1  ;;  %v659_v30 = vrot.slane %v1263_v28, 2  ;;  %v739_v31 = vrot.slane %v1263_v28, 3  ;;  %v819_v32 = vrot.slane %v1263_v28, 4  ;;  %v487_v33 = vpop.f32.mrb[1].mxu1 }
  0xf9   : > { %v500_v34 = vadd.f32 %v487_v33, %v1718_v27  ;;  %v578_v35 = vrot.slane %v487_v33, 1  ;;  %v658_v36 = vrot.slane %v487_v33, 2  ;;  %v738_v37 = vrot.slane %v487_v33, 3 }
  0xfa   : > { %v818_v38 = vrot.slane %v487_v33, 4  ;;  %v1383_v28 = vpack.c.bf16 %v990_v25, %v989_v24  ;;  %v995_v33 = vld [vmem:[%s1854_s6 + $0x30] sm:$0xff] }
  0xfb   : > { %1454 = vtanh.f32 %v500_v34  ;;  %v580_v39 = vsel %vm577_vm2, %v578_v35, %v579_v29  ;;  %v660_v40 = vsel %vm657_vm3, %v658_v36, %v659_v30  ;;  %v740_v41 = vsel %vm737_vm4, %v738_v37, %v739_v31  ;;  %v992_v29 = vld [vmem:[%s1854_s6 + $0x18] sm:$0xff]  ;;  %v993_v30 = vld [vmem:[%s1854_s6 + $0x20] sm:$0xff]  ;;  %v994_v31 = vld [vmem:[%s1854_s6 + $0x28] sm:$0xff] }
  0xfc   : > { %v582_v42 = vadd.f32 %v580_v39, %v1718_v27  ;;  %v662_v43 = vadd.f32 %v660_v40, %v1718_v27  ;;  %v742_v44 = vadd.f32 %v740_v41, %v1718_v27  ;;  %v820_v45 = vsel %vm817_vm5, %v818_v38, %v819_v32  ;;  %v996_v34 = vld [vmem:[%s1854_s6 + $0x38] sm:$0xff] }
  0xfd   : > { %v822_v46 = vadd.f32 %v820_v45, %v1718_v27  ;;  %v1389_v32 = vpack.c.bf16 %v994_v31, %v993_v30  ;;  %v1392_v35 = vpack.c.bf16 %v996_v34, %v995_v33  ;;  %v944_v37 = vrot.slane %v1689_v16, 1 }
  0xfe   : > { %1456 = vtanh.f32 %v582_v42  ;;  %v945_v38 = vrot.slane %v1691_v17, 1  ;;  %v954_v39 = vrot.slane %v1689_v16, 2  ;;  %v955_v40 = vrot.slane %v1691_v17, 2 }
  0xff   : > { %1458 = vtanh.f32 %v662_v43  ;;  %v965_v45 = vrot.slane %v1691_v17, 3 }
 0x100   : > { %1460 = vtanh.f32 %v742_v44  ;;  %v946_v41 = vsel %vm577_vm2, %v944_v37, %v945_v38  ;;  %v964_v44 = vrot.slane %v1689_v16, 3 }
 0x101   : > { %1462 = vtanh.f32 %v822_v46 }
 0x105   : > { %v1455_v47 = vpop.eup %1454 }
 0x106   : > { %1273 = vmatmul.mubr.msk.f32.vlgmr.msra.gmra.mrb[2].mxu0 %vm319_vm1, %v1455_v47 }
 0x107   : > { %1366 = vmatpush3.bf16.msra.mxu0 %v1353_v20  ;;  %1294 = vmatprep.mubr.msk.f32.mxu0 %vm1535_vm0, %v1536_v8 }
 0x108   : > { %v1457_v48 = vpop.eup %1456  ;;  %1367 = vmatprep.subr.bf16.mxu0 %v1534_v3 }
 0x109   : > { %1284 = vmatmul.mubr.msk.f32.vlgmr.msra.gmra.mrb[2].mxu1 %vm319_vm1, %v1457_v48  ;;  %v1459_v49 = vpop.eup %1458  ;;  %v966_v48 = vsel %vm737_vm4, %v964_v44, %v965_v45 }
 0x10a   : > { %1372 = vmatpush3.bf16.msra.mxu1 %v1353_v20  ;;  %1305 = vmatprep.mubr.msk.f32.mxu1 %vm1535_vm0, %v1536_v8  ;;  %v1461_v50 = vpop.eup %1460 }
 0x10b   : > { %1369 = vmatpush3.bf16.msra.mxu0 %v1356_v23  ;;  %1373 = vmatprep.subr.bf16.mxu1 %v1534_v3  ;;  %v1463_v51 = vpop.eup %1462 }
 0x10c   : > { %1376 = vmatprep.subr.bf16.mxu0 %v1534_v3 }
 0x10e   : > { %1295 = vmatmul.mubr.msk.f32.vlgmr.msra.gmra.mrb[4].mxu0 %vm319_vm1, %v1459_v49  ;;  %1375 = vmatpush3.bf16.msra.mxu1 %v1356_v23  ;;  %v974_v49 = vrot.slane %v1689_v16, 4 }
 0x10f   : > { %1378 = vmatpush3.bf16.msra.mxu0 %v1353_v20  ;;  %1316 = vmatprep.mubr.msk.f32.mxu0 %vm1535_vm0, %v1536_v8  ;;  %v1543_v20 = vmov 2  }
 0x110   : > { %1379 = vmatprep.subr.bf16.mxu0 %v1534_v3  ;;  %1382 = vmatprep.subr.bf16.mxu1 %v1534_v3 }
 0x111   : > { %1306 = vmatmul.mubr.msk.f32.vlgmr.msra.gmra.mrb[4].mxu1 %vm319_vm1, %v1461_v50  ;;  %v975_v50 = vrot.slane %v1691_v17, 4 }
 0x112   : > { %1335 = vmatprep.mubr.msk.f32.mxu1 %vm1535_vm0, %v1536_v8  ;;  %1384 = vmatpush3.bf16.msra.mxu1 %v1383_v28 }
 0x113   : > { %1381 = vmatpush3.bf16.msra.mxu0 %v1356_v23  ;;  %v410_v23 = vmax.f32 %v1718_v27, 0.0  ;;  %v1386_v27 = vpack.c.bf16 %v992_v29, %v991_v26  ;;  %1385 = vmatprep.subr.bf16.mxu1 %v1534_v3 }
 0x116   : > { %1317 = vmatmul.mubr.msk.f32.vlgmr.msra.gmra.mrb[6].mxu0 %vm319_vm1, %v1463_v51  ;;  %1387 = vmatpush3.bf16.msra.mxu1 %v1386_v27 }
 0x117   : > { %1388 = vmatprep.subr.bf16.mxu1 %v1534_v3 }
 0x11a   : > { %1390 = vmatpush3.bf16.msra.mxu1 %v1389_v32 }
 0x11b   : > { %1391 = vmatprep.subr.bf16.mxu1 %v1534_v3  ;;  %v956_v3 = vsel %vm657_vm3, %v954_v39, %v955_v40 }
 0x11e   : > { %1393 = vmatpush3.bf16.msra.mxu1 %v1392_v35 }
 0x1d9   : > { %v571_v52 = vpop.f32.mrb[2].mxu0 }
 0x1da   : > { %v1274_v53 = vpop.f32.mrb[3].mxu0 }
 0x1dc   : > { %v653_v54 = vpop.f32.mrb[2].mxu1 }
 0x1dd   : > { %898 = vrot.lane.b32.xlu0 %v653_v54, %s1537_s25  ;;  %v1285_v55 = vpop.f32.mrb[3].mxu1  ;;  %s1179_s25 = sshll.u32 %s307_s24, 3 }
 0x1de   : > { %v976_v55 = vsel %vm817_vm5, %v974_v49, %v975_v50 }
 0x1e1   : > { %v733_v56 = vpop.f32.mrb[4].mxu0 }
 0x1e2   : > { %902 = vrot.lane.b32.xlu0 %v733_v56, %s1538_s26  ;;  %v1296_v57 = vpop.f32.mrb[5].mxu0  ;;  %s1194_s26 = sshll.u32 %s1616_s9, 7  ;;  %s1091_s9 = scalar_lea.sflag [#allocation4], %s307_s24 }
 0x1e3   : > { %s1805_s18 = scalar_lea.hbm %s1856_s8, %s1194_s26 }
 0x1e4   : > { %v813_v58 = vpop.f32.mrb[4].mxu1 }
 0x1e5   : > { %906 = vrot.lane.b32.xlu1 %v813_v58, %s1539_s10  ;;  %v1307_v59 = vpop.f32.mrb[5].mxu1  ;;  %s309_s10 = scalar_lea.vmem [#allocation3], %s1179_s25 }
 0x1e9   : > { %v893_v60 = vpop.f32.mrb[6].mxu0 }
 0x1ea   : > { %910 = vrot.lane.b32.xlu1 %v893_v60, %s1540_s12  ;;  %v1318_v61 = vpop.f32.mrb[7].mxu0  ;;  %s1104_s12 = sshll.u32 %s309_s10, 4  ;;  %s1807_s12 = int_to_ptr.vmem [resolvable:$true] %s1104_s12 }
 0x1eb   : > { %s1470_s19 = scalar_lea.vmem %s1807_s12, 128 }
 0x1ec   : > { %p1471_p11 = scmp.ne.s32.totalorder %s1807_s12, %s1470_s19 }
 0x1ee   : > { %p1472_p12 = pnand %p1471_p11, %p1633_p5 }
 0x1f0   : > { %p1473_p13 = pneg %p1472_p12 }
 0x24f   : > { %v899_v62 = vpop.permute.xlu0 %898 }
 0x250   : > { %v914_v1 = vsel %vm913_vm6, %v571_v52, %v899_v62  ;;  %v1191_v62 = vld [vmem:[%s1855_s7] ss:$0 sm:$0xff] }
 0x254   : > { %v903_v0 = vpop.permute.xlu0 %902 }
 0x255   : > { %v916_v2 = vsel %vm915_vm7, %v914_v1, %v903_v0 }
 0x257   : > { %v907_v63 = vpop.permute.xlu1 %906 }
 0x258   : > { %v918_v4 = vsel %vm917_vm8, %v916_v2, %v907_v63 }
 0x25c   : > { %v911_v5 = vpop.permute.xlu1 %910 }
 0x25d   : > { %v920_v6 = vsel %vm919_vm9, %v918_v4, %v911_v5 }
 0x25e   : > { %v922_v7 = vsel %vm921_vm10, %v920_v6, -inf }
 0x25f   : > { %923 = vmax.xlane.f32.xlu0 %v922_v7 }
 0x2ec   : > { %v924_v8 = vpop.xlane.xlu0 %923 }
 0x2ed   : > { %v925_v9 = vsub.f32 %v920_v6, %v924_v8 }
 0x2ef   : > { %v926_v10 = vmul.f32 1.442695, %v925_v9 }
 0x2f1   : > { %1464 = vpow2.f32 %v926_v10 }
 0x2fb   : > { %v1465_v11 = vpop.eup %1464 }
 0x2fc   : > { %v928_v12 = vsel %vm921_vm10, %v1465_v11, 0.0 }
 0x2fd   : > { %929 = vadd.xlane.f32.xlu1 %v928_v12 }
 0x38a   : > { %v930_v15 = vpop.xlane.xlu1 %929 }
 0x38b   : > { %1466 = vrcp.f32 %v930_v15 }
 0x395   : > { %v1467_v18 = vpop.eup %1466 }
 0x396   : > { %v1747_v19 = vmul.f32 %v1467_v18, %v1465_v11 }
 0x398   : > { %941 = vperm.xlu1 %1449, %v1747_v19   ;;  %935 = vperm.xlu0 %1448, %v1747_v19  }
 0x39c   : > { %1450 = vset.pattern.permute.xlu1 %v1543_v20  ;;  %1453 = vset.pattern.permute.xlu0 %v1544_v21 }
 0x39d   : > { %951 = vperm.xlu1 %1450, %v1747_v19  }
 0x3a1   : > { %1451 = vset.pattern.permute.xlu1 %v1545_v22 }
 0x3a2   : > { %961 = vperm.xlu1 %1451, %v1747_v19  }
 0x3a6   : > { %1452 = vset.pattern.permute.xlu1 %v1544_v21 }
 0x3a7   : > { %971 = vperm.xlu1 %1452, %v1747_v19  }
 0x3ab   : > { %981 = vrot.lane.b32.xlu1 %v410_v23, %s1546_s13 }
 0x417   : > { %v942_v36 = vpop.permute.xlu1 %941  ;;  %v936_v42 = vpop.permute.xlu0 %935 }
 0x418   : > { %v948_v46 = vmul.f32 %v946_v41, %v942_v36  ;;  %v938_v47 = vmul.f32 %v936_v42, %v1689_v16 }
 0x41a   : > { %v949_v53 = vadd.f32 %v948_v46, %v938_v47 }
 0x41c   : > { %v952_v43 = vpop.permute.xlu1 %951 }
 0x41d   : > { %v958_v51 = vmul.f32 %v956_v3, %v952_v43 }
 0x41f   : > { %v959_v56 = vadd.f32 %v958_v51, %v949_v53 }
 0x421   : > { %v962_v52 = vpop.permute.xlu1 %961 }
 0x422   : > { %v968_v54 = vmul.f32 %v966_v48, %v962_v52 }
 0x424   : > { %v969_v58 = vadd.f32 %v968_v54, %v959_v56 }
 0x426   : > { %v972_v57 = vpop.permute.xlu1 %971 }
 0x427   : > { %v978_v59 = vmul.f32 %v976_v55, %v972_v57 }
 0x429   : > { %v979_v60 = vadd.f32 %v978_v59, %v969_v58 }
 0x42a   : > { %v982_v16 = vpop.permute.xlu1 %981 }
 0x42b   : > { %985 = vrot.lane.b32.xlu1 %v979_v60, %s1547_s20  ;;  %s1549_s20 = smov [#allocation3]  }
 0x42f   : > { %1082 = vrot.lane.b32.xlu1 %v1747_v19, %s1548_s21  ;;  %s1474_s21 = sshll.u32 %s1549_s20, 4  ;;  %s1475_s21 = int_to_ptr.vmem [resolvable:$false] %s1474_s21 }
 0x430   : > { %s1476_s22 = scalar_lea.vmem %s1475_s21, 256  ;;  %p1477_p0 = scmp.lt.s32.totalorder %s1807_s12, %s1475_s21 }
 0x431   : > { %p1478_p1 = scmp.lt.s32.totalorder %s1476_s22, %s1470_s19 }
 0x433   : > { %p1479_p2 = por %p1478_p1, %p1477_p0 }
 0x435   : > { %p1480_p3 = pnand %p1479_p2, %p1473_p13 }
 0x49d   : > { %v986_v17 = vpop.permute.xlu1 %985 }
 0x49e   : > { %v988_v61 = vsel %vm319_vm1, %v982_v16, %v986_v17 }
 0x49f   : > { %1336 = vmatmul.mubr.msk.f32.vlgmr.msra.gmra.mrb[6].mxu1 %vm1004_vm11, %v988_v61 }
 0x4a1   : > { %v1083_v7 = vpop.permute.xlu1 %1082 }
 0x572   : > { %v1074_v63 = vpop.f32.mrb[6].mxu1 }
 0x573   : > { %v1075_v0 = vadd.f32 %v1191_v62, %v1074_v63  ;;  %v1337_v1 = vpop.f32.mrb[7].mxu1 }
 0x575   : > { %v1078_v2 = vmul.f32 0.5, %v1075_v0 }
 0x577   : > { %1468 = vtanh.f32 %v1078_v2 }
 0x581   : > { %v1469_v4 = vpop.eup %1468 }
 0x582   : > { %v1080_v5 = vadd.f32 1.0, %v1469_v4 }
 0x584   : > { %v1081_v6 = vmul.f32 0.5, %v1080_v5 }
 0x586   : > { %v1086_v8 = vsel %vm1085_vm12, %v1081_v6, %v1083_v7 }
 0x587   : > { %v1088_v9 = vsel %vm1087_vm13, %v1086_v8, 0.0 }
 0x588   : > { %1089 = vst.msk [vmem:[%s309_s10] sm:$0xff] %vm319_vm1, %v1088_v9 }
 0x589   : > { %1483 = shalt.err (!%p1480_p3)
}
 0x58a   : > { %s1484_s23 = scalar_lea.hbm %s1805_s18, 128  ;;  %s1488_s26 = scalar_lea.hbm %s1856_s8, 256 }
 0x58b   : > { %p1485_p4 = scmp.ne.s32.totalorder %s1805_s18, %s1484_s23  ;;  %p1489_p9 = scmp.lt.u32.totalorder %s1805_s18, %s1856_s8 }
 0x58c   : > { %p1490_p10 = scmp.lt.u32.totalorder %s1488_s26, %s1484_s23  ;;  %p1492_p12 = scmp.lt.u32.totalorder %s1484_s23, %s1805_s18 }
 0x58d   : > { %p1486_p7 = pnand %p1485_p4, %p1633_p5 }
 0x58e   : > { %p1491_p11 = por %p1490_p10, %p1489_p9 }
 0x58f   : > { %p1487_p8 = pneg %p1486_p7 }
 0x590   : > { %p1493_p13 = por %p1492_p12, %p1491_p11 }
 0x592   : > { %p1494_p0 = pnand %p1493_p13, %p1487_p8 }
 0x594   : > { %1497 = shalt.err (!%p1494_p0)
}
 0x595   : > { %1394 = dma.vmem_to_hbm [thread:$0]  (%p1633_p5), %s1807_s12, 128, %s1805_s18, %s1091_s9  }
 0x596 PF: > { %p1400_p1 = scmp.ge.s32.totalorder %s1532_s30, 2  ;;  %s1116_s17 = sand.u32 1, %s1520_s27  }
 0x597   : > { %s1117_s19 = scalar_lea.sflag [#allocation4], %s1116_s17 }
 0x598   : > { %p1397_p2 = pnand %p1400_p1, %p1637_p6 }
 0x59a   : > { %1515 = dma.done.wait (!%p1397_p2), %s1117_s19, 128  }
 0x59b   : > { %1517 = vsyncadd (!%p1397_p2), %s1117_s19, 4294967168  ;;  %p18_p3 = scmp.ge.s32.totalorder %s1620_s11, 4   ;;  %s1859_s27 = smov %s1524_s28 }
 0x59c   : > { %s1860_s28 = smov %s1528_s29  ;;  %s1861_s29 = smov %s1631_s14 }
 0x59d   : > { %s1862_s30 = smov %s1620_s11  ;;  %20 = sbr.rel (!%p18_p3) target bundleno = 3 (0x3), region = 90 }
 0x5a4   :  { %1122 = vsyncpa [#allocation4], 1 }
 0x5a5   :  { %1124 = vsyncpa [#allocation4 + $0x1], 1 }

</bundles_post_ra>
